<compile_context>
chip_gen: v5e
topology: v5e:2x2
jax: 0.10.0
libtpu: 0.0.40
codegen_flags: <defaults>
</compile_context>

<pallas_src>
import math

import jax
import jax.numpy as jnp
from jax.experimental import pallas as pl
from jax.experimental.pallas import tpu as pltpu


def _round_up(v, m):
    return (v + m - 1) // m * m


def _lora_kernel(x_ref, wt_ref, at_ref, bt_ref, bias_ref, o_ref, acc_ref, xa_ref):
    """One (i, j, k) grid step.

    x_ref:   (tm, tk)  operand dtype
    wt_ref:  (tk, tn)  operand dtype   (W^T tile)
    at_ref:  (tk, r)   operand dtype   (A^T tile)
    bt_ref:  (r,  tn)  operand dtype   ((scale*B)^T tile)
    bias_ref:(1,  tn)  f32
    o_ref:   (tm, tn)  out dtype
    acc_ref: (tm, tn)  f32 scratch (base-matmul accumulator, resident over k)
    xa_ref:  (tm, r)   f32 scratch (x @ A^T accumulator, resident over k)
    """
    k = pl.program_id(2)

    @pl.when(k == 0)
    def _init():
        acc_ref[...] = jnp.zeros_like(acc_ref)
        xa_ref[...] = jnp.zeros_like(xa_ref)

    x = x_ref[...]
    # Base path: (tm, tk) @ (tk, tn) -> f32 accumulate on the MXU.
    acc_ref[...] += jnp.dot(x, wt_ref[...], preferred_element_type=jnp.float32)
    # LoRA down-projection: (tm, tk) @ (tk, r) -> f32 accumulate (tiny).
    xa_ref[...] += jnp.dot(x, at_ref[...], preferred_element_type=jnp.float32)

    @pl.when(k == pl.num_programs(2) - 1)
    def _epilogue():
        # LoRA up-projection in f32 (contraction dim = r, negligible flops);
        # scale is already folded into bt in the wrapper.
        lora = jnp.dot(xa_ref[...], bt_ref[...].astype(jnp.float32),
                       preferred_element_type=jnp.float32)
        o_ref[...] = (acc_ref[...] + lora + bias_ref[...]).astype(o_ref.dtype)


def lora_linear_merged(x2d, w, lora_a, lora_b, bias, scale, *,
                       tm=512, tn=512, tk=512,
                       operand_dtype=jnp.bfloat16, out_dtype=jnp.float32):
    """x2d: (M, in) -> (M, out) via merged-LoRA linear (unmerged compute)."""
    M, K = x2d.shape
    N = w.shape[0]
    r = lora_a.shape[0]

    # Fold the LoRA scale into B once (O(N*r) work, outside the grid).
    b_scaled = lora_b * scale

    # One-time HBM-side transposes so the in-kernel contractions are standard
    # (m,k)@(k,n) with the output dim lane-dense.
    w_t = w.T            # (K, N)
    a_t = lora_a.T       # (K, r)
    b_t = b_scaled.T     # (r, N)

    # bf16 operands / f32 accumulate by default (kernel is HBM-bound).
    if operand_dtype is not None:
        x2d = x2d.astype(operand_dtype)
        w_t = w_t.astype(operand_dtype)
        a_t = a_t.astype(operand_dtype)
        b_t = b_t.astype(operand_dtype)
    bias2d = bias.reshape(1, N).astype(jnp.float32)

    # Tile sizes: clamp to the (rounded-up) problem dims; keep lane dims a
    # multiple of 128 and sublane dims a multiple of 8.
    tm = min(tm, _round_up(M, 8))
    tn = min(tn, _round_up(N, 128))
    tk = min(tk, _round_up(K, 128))

    m_pad = _round_up(M, tm)
    n_pad = _round_up(N, tn)
    k_pad = _round_up(K, tk)

    # Zero-pad to tile multiples (zeros contribute nothing to the matmuls);
    # never fall back to a full-N tile that could exceed VMEM.
    if (m_pad, k_pad) != (M, K):
        x2d = jnp.pad(x2d, ((0, m_pad - M), (0, k_pad - K)))
    if (k_pad, n_pad) != (K, N):
        w_t = jnp.pad(w_t, ((0, k_pad - K), (0, n_pad - N)))
    if k_pad != K:
        a_t = jnp.pad(a_t, ((0, k_pad - K), (0, 0)))
    if n_pad != N:
        b_t = jnp.pad(b_t, ((0, 0), (0, n_pad - N)))
        bias2d = jnp.pad(bias2d, ((0, 0), (0, n_pad - N)))

    grid = (m_pad // tm, n_pad // tn, k_pad // tk)

    op_bytes = x2d.dtype.itemsize
    out_bytes = jnp.dtype(out_dtype).itemsize
    cost = pl.CostEstimate(
        flops=2 * m_pad * k_pad * n_pad + 2 * m_pad * k_pad * r + 2 * m_pad * r * n_pad,
        transcendentals=0,
        bytes_accessed=int(
            (m_pad * k_pad + k_pad * n_pad + k_pad * r + r * n_pad) * op_bytes
            + n_pad * 4 + m_pad * n_pad * out_bytes),
    )

    out2d = pl.pallas_call(
        _lora_kernel,
        out_shape=jax.ShapeDtypeStruct((m_pad, n_pad), out_dtype),
        grid_spec=pltpu.PrefetchScalarGridSpec(
            num_scalar_prefetch=0,
            grid=grid,
            in_specs=[
                pl.BlockSpec((tm, tk), lambda i, j, k: (i, k)),   # x tile
                pl.BlockSpec((tk, tn), lambda i, j, k: (k, j)),   # W^T tile
                pl.BlockSpec((tk, r), lambda i, j, k: (k, 0)),    # A^T tile (tiny)
                pl.BlockSpec((r, tn), lambda i, j, k: (0, j)),    # (scale*B)^T tile
                pl.BlockSpec((1, tn), lambda i, j, k: (0, j)),    # bias tile
            ],
            out_specs=pl.BlockSpec((tm, tn), lambda i, j, k: (i, j)),
            scratch_shapes=[
                pltpu.VMEM((tm, tn), jnp.float32),   # base accumulator
                pltpu.VMEM((tm, r), jnp.float32),    # x @ A^T accumulator
            ],
        ),
        compiler_params=pltpu.CompilerParams(
            dimension_semantics=("parallel", "parallel", "arbitrary"),
            vmem_limit_bytes=48 << 20,
        ),
        cost_estimate=cost,
    )(x2d, w_t, a_t, b_t, bias2d)

    return out2d[:M, :N]


def lora_linear_forward(x, w, lora_a, lora_b, bias, scale, *,
                        tm=512, tn=512, tk=512,
                        operand_dtype=jnp.bfloat16, out_dtype=jnp.float32):
    """x: (..., in_features) -> (..., out_features). Eval-mode LoRA forward."""
    lead = x.shape[:-1]
    K = x.shape[-1]
    N = w.shape[0]
    x2d = x.reshape(-1, K)
    out2d = lora_linear_merged(x2d, w, lora_a, lora_b, bias, scale,
                               tm=tm, tn=tn, tk=tk,
                               operand_dtype=operand_dtype, out_dtype=out_dtype)
    return out2d.reshape(*lead, N)


if __name__ == "__main__":
    # Shapes consistent with the module: tokens through LoRALinear(32, 32).
    batch, seq = 2, 8
    in_features, out_features = 32, 32
    rank, lora_alpha = 16, 16
    scale = lora_alpha / rank

    key = jax.random.PRNGKey(0)
    k_w, k_b, k_a, k_lb, k_x = jax.random.split(key, 5)

    # nn.Linear default init: U(-1/sqrt(in), 1/sqrt(in)) for weight and bias.
    bound_w = 1.0 / math.sqrt(in_features)
    w = jax.random.uniform(k_w, (out_features, in_features), jnp.float32,
                           -bound_w, bound_w)
    bias = jax.random.uniform(k_b, (out_features,), jnp.float32,
                              -bound_w, bound_w)

    # lora_a: kaiming_uniform_(a=sqrt(5)); lora_b is zeros in the module — use
    # small non-zero values so the LoRA path is exercised numerically.
    bound_a = math.sqrt(6.0 / ((1.0 + 5.0) * in_features))
    lora_a = jax.random.uniform(k_a, (rank, in_features), jnp.float32,
                                -bound_a, bound_a)
    lora_b = 0.02 * jax.random.normal(k_lb, (out_features, rank), jnp.float32)

    x = jax.random.normal(k_x, (batch, seq, in_features), jnp.float32)

    w_eff = w + scale * (lora_b @ lora_a)
    ref = jnp.einsum("bsk,nk->bsn", x, w_eff) + bias

    # f32-operand path: must match the PyTorch merge=True forward tightly.
    out_f32 = lora_linear_forward(x, w, lora_a, lora_b, bias, scale,
                                  operand_dtype=jnp.float32)
    jax.block_until_ready(out_f32)
    assert out_f32.shape == (batch, seq, out_features)
    assert jnp.allclose(out_f32, ref, atol=1e-5, rtol=1e-5)

    # Default bf16-operand / f32-accumulate path (recommended, HBM-bound kernel).
    out_bf16 = lora_linear_forward(x, w, lora_a, lora_b, bias, scale)
    jax.block_until_ready(out_bf16)
    assert jnp.allclose(out_bf16, ref, atol=5e-2, rtol=5e-2)

    # Ragged / multi-step-K config: exercises K-tiling accumulator, N padding,
    # and multiple row tiles (in=160 -> 2 K-steps with tk=128, out=96 -> padded to 128).
    in2, out2 = 160, 96
    k_w2, k_b2, k_a2, k_lb2, k_x2 = jax.random.split(jax.random.PRNGKey(1), 5)
    bw2 = 1.0 / math.sqrt(in2)
    w2 = jax.random.uniform(k_w2, (out2, in2), jnp.float32, -bw2, bw2)
    bias2 = jax.random.uniform(k_b2, (out2,), jnp.float32, -bw2, bw2)
    ba2 = math.sqrt(6.0 / (6.0 * in2))
    a2 = jax.random.uniform(k_a2, (rank, in2), jnp.float32, -ba2, ba2)
    b2 = 0.02 * jax.random.normal(k_lb2, (out2, rank), jnp.float32)
    x2 = jax.random.normal(k_x2, (batch, seq, in2), jnp.float32)

    out2_f32 = lora_linear_forward(x2, w2, a2, b2, bias2, scale,
                                   operand_dtype=jnp.float32,
                                   tm=8, tn=128, tk=128)
    jax.block_until_ready(out2_f32)
    ref2 = jnp.einsum("bsk,nk->bsn", x2, w2 + scale * (b2 @ a2)) + bias2
    assert out2_f32.shape == (batch, seq, out2)
    assert jnp.allclose(out2_f32, ref2, atol=1e-5, rtol=1e-5)

    print("KERNEL_OK")
</pallas_src>

<mosaic_0001>
module attributes {stable_mosaic.version = 11 : i64} {
  func.func @_lora_kernel(%arg0: i32, %arg1: i32, %arg2: i32, %arg3: memref<16x128xf32, #tpu.memory_space<vmem>>, %arg4: memref<128x128xf32, #tpu.memory_space<vmem>>, %arg5: memref<128x16xf32, #tpu.memory_space<vmem>>, %arg6: memref<16x128xf32, #tpu.memory_space<vmem>>, %arg7: memref<1x128xf32, #tpu.memory_space<vmem>>, %arg8: memref<16x128xf32, #tpu.memory_space<vmem>>, %arg9: memref<16x128xf32, #tpu.memory_space<vmem>>, %arg10: memref<16x16xf32, #tpu.memory_space<vmem>>) attributes {dimension_semantics = [#tpu.dimension_semantics<parallel>, #tpu.dimension_semantics<parallel>, #tpu.dimension_semantics<arbitrary>], iteration_bounds = array<i64: 1, 1, 1>, scalar_prefetch = 0 : i64, scratch_operands = 2 : i64, tpu.core_type = #tpu.core_type<tc>, window_params = [{transform_indices = @transform_0, window_bounds = array<i64: 16, 128>}, {transform_indices = @transform_1, window_bounds = array<i64: 128, 128>}, {transform_indices = @transform_2, window_bounds = array<i64: 128, 16>}, {transform_indices = @transform_3, window_bounds = array<i64: 16, 128>}, {transform_indices = @transform_4, window_bounds = array<i64: 1, 128>}, {transform_indices = @transform_5, window_bounds = array<i64: 16, 128>}]} {
    %c0_i32 = arith.constant 0 : i32
    %0 = arith.cmpi eq, %arg2, %c0_i32 : i32
    %1 = arith.extui %0 : i1 to i32
    %c0_i32_0 = arith.constant 0 : i32
    %2 = arith.cmpi ne, %1, %c0_i32_0 : i32
    scf.if %2 {
      %cst_17 = arith.constant 0.000000e+00 : f32
      %17 = vector.broadcast %cst_17 : f32 to vector<16x128xf32>
      %c0_18 = arith.constant 0 : index
      %c0_19 = arith.constant 0 : index
      %18 = vector.load %arg9[%c0_18, %c0_19] : memref<16x128xf32, #tpu.memory_space<vmem>>, vector<16x128xf32>
      tpu.vector_store %arg9[%c0_18, %c0_19], %17 {strides = array<i32>} : memref<16x128xf32, #tpu.memory_space<vmem>>, vector<16x128xf32>,
      %cst_20 = arith.constant 0.000000e+00 : f32
      %19 = vector.broadcast %cst_20 : f32 to vector<16x16xf32>
      %c0_21 = arith.constant 0 : index
      %c0_22 = arith.constant 0 : index
      %20 = vector.load %arg10[%c0_21, %c0_22] : memref<16x16xf32, #tpu.memory_space<vmem>>, vector<16x16xf32>
      tpu.vector_store %arg10[%c0_21, %c0_22], %19 {strides = array<i32>} : memref<16x16xf32, #tpu.memory_space<vmem>>, vector<16x16xf32>,
    } else {
    }
    %c0 = arith.constant 0 : index
    %c0_1 = arith.constant 0 : index
    %3 = vector.load %arg3[%c0, %c0_1] : memref<16x128xf32, #tpu.memory_space<vmem>>, vector<16x128xf32>
    %c0_2 = arith.constant 0 : index
    %c0_3 = arith.constant 0 : index
    %4 = vector.load %arg9[%c0_2, %c0_3] : memref<16x128xf32, #tpu.memory_space<vmem>>, vector<16x128xf32>
    %c0_4 = arith.constant 0 : index
    %c0_5 = arith.constant 0 : index
    %5 = vector.load %arg4[%c0_4, %c0_5] : memref<128x128xf32, #tpu.memory_space<vmem>>, vector<128x128xf32>
    %cst = arith.constant dense<0.000000e+00> : vector<16x128xf32>
    %6 = tpu.matmul %3, %5, %cst {dimension_numbers = #tpu.dot_dimension_numbers<[1], [0], [0], [1], [0, 0, 1, 1], [], []>} : vector<16x128xf32>, vector<128x128xf32>, vector<16x128xf32> -> vector<16x128xf32>
    %7 = arith.addf %4, %6 : vector<16x128xf32>
    %c0_6 = arith.constant 0 : index
    %c0_7 = arith.constant 0 : index
    %8 = vector.load %arg9[%c0_6, %c0_7] : memref<16x128xf32, #tpu.memory_space<vmem>>, vector<16x128xf32>
    tpu.vector_store %arg9[%c0_6, %c0_7], %7 {strides = array<i32>} : memref<16x128xf32, #tpu.memory_space<vmem>>, vector<16x128xf32>,
    %c0_8 = arith.constant 0 : index
    %c0_9 = arith.constant 0 : index
    %9 = vector.load %arg10[%c0_8, %c0_9] : memref<16x16xf32, #tpu.memory_space<vmem>>, vector<16x16xf32>
    %c0_10 = arith.constant 0 : index
    %c0_11 = arith.constant 0 : index
    %10 = vector.load %arg5[%c0_10, %c0_11] : memref<128x16xf32, #tpu.memory_space<vmem>>, vector<128x16xf32>
    %cst_12 = arith.constant dense<0.000000e+00> : vector<16x16xf32>
    %11 = tpu.matmul %3, %10, %cst_12 {dimension_numbers = #tpu.dot_dimension_numbers<[1], [0], [0], [1], [0, 0, 1, 1], [], []>} : vector<16x128xf32>, vector<128x16xf32>, vector<16x16xf32> -> vector<16x16xf32>
    %12 = arith.addf %9, %11 : vector<16x16xf32>
    %c0_13 = arith.constant 0 : index
    %c0_14 = arith.constant 0 : index
    %13 = vector.load %arg10[%c0_13, %c0_14] : memref<16x16xf32, #tpu.memory_space<vmem>>, vector<16x16xf32>
    tpu.vector_store %arg10[%c0_13, %c0_14], %12 {strides = array<i32>} : memref<16x16xf32, #tpu.memory_space<vmem>>, vector<16x16xf32>,
    %c0_i32_15 = arith.constant 0 : i32
    %14 = arith.cmpi eq, %arg2, %c0_i32_15 : i32
    %15 = arith.extui %14 : i1 to i32
    %c0_i32_16 = arith.constant 0 : i32
    %16 = arith.cmpi ne, %15, %c0_i32_16 : i32
    scf.if %16 {
      %c0_17 = arith.constant 0 : index
      %c0_18 = arith.constant 0 : index
      %17 = vector.load %arg10[%c0_17, %c0_18] : memref<16x16xf32, #tpu.memory_space<vmem>>, vector<16x16xf32>
      %c0_19 = arith.constant 0 : index
      %c0_20 = arith.constant 0 : index
      %18 = vector.load %arg6[%c0_19, %c0_20] : memref<16x128xf32, #tpu.memory_space<vmem>>, vector<16x128xf32>
      %cst_21 = arith.constant dense<0.000000e+00> : vector<16x128xf32>
      %19 = tpu.matmul %17, %18, %cst_21 {dimension_numbers = #tpu.dot_dimension_numbers<[1], [0], [0], [1], [0, 0, 1, 1], [], []>} : vector<16x16xf32>, vector<16x128xf32>, vector<16x128xf32> -> vector<16x128xf32>
      %c0_22 = arith.constant 0 : index
      %c0_23 = arith.constant 0 : index
      %20 = vector.load %arg9[%c0_22, %c0_23] : memref<16x128xf32, #tpu.memory_space<vmem>>, vector<16x128xf32>
      %21 = arith.addf %20, %19 : vector<16x128xf32>
      %c0_24 = arith.constant 0 : index
      %c0_25 = arith.constant 0 : index
      %22 = vector.load %arg7[%c0_24, %c0_25] : memref<1x128xf32, #tpu.memory_space<vmem>>, vector<1x128xf32>
      %23 = vector.broadcast %22 : vector<1x128xf32> to vector<16x128xf32>
      %24 = arith.addf %21, %23 : vector<16x128xf32>
      %c0_26 = arith.constant 0 : index
      %c0_27 = arith.constant 0 : index
      %25 = vector.load %arg8[%c0_26, %c0_27] : memref<16x128xf32, #tpu.memory_space<vmem>>, vector<16x128xf32>
      tpu.vector_store %arg8[%c0_26, %c0_27], %24 {strides = array<i32>} : memref<16x128xf32, #tpu.memory_space<vmem>>, vector<16x128xf32>,
    } else {
    }
    return
  }
  func.func @transform_0(%arg0: i32, %arg1: i32, %arg2: i32) -> (i32, i32) {
    %c0_i32 = arith.constant 0 : i32
    return %arg0, %arg2 : i32, i32
  }
  func.func @transform_1(%arg0: i32, %arg1: i32, %arg2: i32) -> (i32, i32) {
    %c0_i32 = arith.constant 0 : i32
    return %arg2, %arg1 : i32, i32
  }
  func.func @transform_2(%arg0: i32, %arg1: i32, %arg2: i32) -> (i32, i32) {
    %c0_i32 = arith.constant 0 : i32
    %c0_i32_0 = arith.constant 0 : i32
    return %arg2, %c0_i32 : i32, i32
  }
  func.func @transform_3(%arg0: i32, %arg1: i32, %arg2: i32) -> (i32, i32) {
    %c0_i32 = arith.constant 0 : i32
    %c0_i32_0 = arith.constant 0 : i32
    return %c0_i32, %arg1 : i32, i32
  }
  func.func @transform_4(%arg0: i32, %arg1: i32, %arg2: i32) -> (i32, i32) {
    %c0_i32 = arith.constant 0 : i32
    %c0_i32_0 = arith.constant 0 : i32
    return %c0_i32, %arg1 : i32, i32
  }
  func.func @transform_5(%arg0: i32, %arg1: i32, %arg2: i32) -> (i32, i32) {
    %c0_i32 = arith.constant 0 : i32
    return %arg0, %arg1 : i32, i32
  }
}

</mosaic_0001>

<bundles_post_ra>
// kernel: tpu_custom_call.1
= control target key start
LH: loop header
LB: loop body
LE: loop exit
PB: predicated region body
PF: predicated region fallthrough
CT: control target
= control target key end

     0   :  { %10 = vsyncpa [#allocation5], 0  ;;  %s440_s0 = inlined_call_operand.vmem [shape: f32[16,128], index: 0, kind: input, shape index: {}]   ;;  %s441_s1 = inlined_call_operand.vmem [shape: f32[128,128], index: 1, kind: input, shape index: {}]   ;;  %s442_s2 = inlined_call_operand.vmem [shape: f32[128,16], index: 2, kind: input, shape index: {}]   ;;  %s443_s3 = inlined_call_operand.hbm [shape: f32[16,128], index: 3, kind: input, shape index: {}]   ;;  %s444_s4 = inlined_call_operand.vmem [shape: f32[1,128], index: 4, kind: input, shape index: {}]   ;;  %s445_s5 = inlined_call_operand.hbm [shape: f32[16,128], index: 5, kind: output, shape index: {}]  }
   0x1   :  { %11 = vsyncpa [#allocation6], 0  ;;  %s22_s20 = sshll.u32 %s443_s3, 4  ;;  %s282_s21 = smov [#allocation4]   ;;  %s23_s20 = int_to_ptr.hbm [resolvable:$true] %s22_s20 }
   0x2   :  { %s24_s22 = sshll.u32 %s282_s21, 4  ;;  %s283_s23 = smov 128   ;;  %s25_s22 = int_to_ptr.vmem [resolvable:$true] %s24_s22 }
   0x3   :  { %s284_s24 = smov 8  }
   0x4   :  { %30 = dma.hbm_to_vmem [thread:$0]  %s23_s20, 256, %s25_s22, [#allocation5], %s283_s23, %s283_s23, %s284_s24  }
   0x5   :  { %278 = dma.done.wait [#allocation5], 256  }
   0x6   :  { %279 = vsyncadd [#allocation5], 4294967040  ;;  %v110_v0 = vld [vmem:[%s442_s2 + $0x78] sm:$0xff]  ;;  %v109_v1 = vld [vmem:[%s442_s2 + $0x70] sm:$0xff]  ;;  %vm43_vm0 = vcmask 130048   ;;  %v285_v8 = vmov 0.0  }
   0x7   :  { %111 = vmatpush.msra.mxu1 %v110_v0  ;;  %v108_v2 = vld [vmem:[%s442_s2 + $0x68] sm:$0xff]  ;;  %v107_v3 = vld [vmem:[%s442_s2 + $0x60] sm:$0xff]  ;;  %v106_v4 = vld [vmem:[%s442_s2 + $0x58] sm:$0xff]  ;;  %44 = vst.msk [vmem:[#allocation3] sm:$0xff] %vm43_vm0, %v285_v8  ;;  %s286_s18 = smov [#allocation7]   ;;  %s193_s22 = sshll.u32 %s445_s5, 4  ;;  %s194_s22 = int_to_ptr.hbm [resolvable:$true] %s193_s22 }
   0x8   :  { %v105_v5 = vld [vmem:[%s442_s2 + $0x50] sm:$0xff]  ;;  %v65_v6 = vld [vmem:[%s441_s1 + $0x78] sm:$0xff]  ;;  %v104_v9 = vld [vmem:[%s442_s2 + $0x48] sm:$0xff]  ;;  %45 = vst.msk [vmem:[#allocation3 + $0x8] sm:$0xff] %vm43_vm0, %v285_v8  ;;  %s191_s19 = sshll.u32 %s286_s18, 4  ;;  %s192_s19 = int_to_ptr.vmem [resolvable:$true] %s191_s19 }
   0x9   :  { %112 = vmatpush.msra.mxu1 %v109_v1  ;;  %v64_v7 = vld [vmem:[%s441_s1 + $0x70] sm:$0xff]  ;;  %66 = vmatpush.msra.mxu0 %v65_v6  ;;  %v63_v10 = vld [vmem:[%s441_s1 + $0x68] sm:$0xff]  ;;  %v103_v11 = vld [vmem:[%s442_s2 + $0x40] sm:$0xff] }
   0xa   :  { %208 = vmatpush.msra.mxu3 %v65_v6  ;;  %v62_v12 = vld [vmem:[%s441_s1 + $0x60] sm:$0xff]  ;;  %v102_v13 = vld [vmem:[%s442_s2 + $0x38] sm:$0xff]  ;;  %v101_v15 = vld [vmem:[%s442_s2 + $0x30] sm:$0xff] }
   0xb   :  { %113 = vmatpush.msra.mxu1 %v108_v2  ;;  %67 = vmatpush.msra.mxu0 %v64_v7  ;;  %v61_v14 = vld [vmem:[%s441_s1 + $0x58] sm:$0xff]  ;;  %v60_v16 = vld [vmem:[%s441_s1 + $0x50] sm:$0xff]  ;;  %v100_v17 = vld [vmem:[%s442_s2 + $0x28] sm:$0xff] }
   0xc   :  { %209 = vmatpush.msra.mxu3 %v64_v7  ;;  %v59_v18 = vld [vmem:[%s441_s1 + $0x48] sm:$0xff]  ;;  %v99_v19 = vld [vmem:[%s442_s2 + $0x20] sm:$0xff]  ;;  %v98_v21 = vld [vmem:[%s442_s2 + $0x18] sm:$0xff] }
   0xd   :  { %114 = vmatpush.msra.mxu1 %v107_v3  ;;  %68 = vmatpush.msra.mxu0 %v63_v10  ;;  %v58_v20 = vld [vmem:[%s441_s1 + $0x40] sm:$0xff]  ;;  %v97_v22 = vld [vmem:[%s442_s2 + $0x10] sm:$0xff]  ;;  %v96_v23 = vld [vmem:[%s442_s2 + $0x8] sm:$0xff] }
   0xe   :  { %210 = vmatpush.msra.mxu3 %v63_v10  ;;  %v95_v24 = vld [vmem:[%s442_s2] sm:$0xff]  ;;  %v47_v26 = vld [vmem:[%s440_s0 + $0x8] sm:$0xff]  ;;  %v57_v27 = vld [vmem:[%s441_s1 + $0x38] sm:$0xff] }
   0xf   :  { %115 = vmatpush.msra.mxu1 %v106_v4  ;;  %69 = vmatpush.msra.mxu0 %v62_v12  ;;  %v46_v25 = vld [vmem:[%s440_s0] sm:$0xff]  ;;  %v56_v28 = vld [vmem:[%s441_s1 + $0x30] sm:$0xff]  ;;  %v55_v29 = vld [vmem:[%s441_s1 + $0x28] sm:$0xff] }
  0x10   :  { %211 = vmatpush.msra.mxu3 %v62_v12  ;;  %v54_v30 = vld [vmem:[%s441_s1 + $0x20] sm:$0xff]  ;;  %v145_v31 = vld [vmem:[#allocation4 + $0x8] sm:$0xff]  ;;  %v144_v33 = vld [vmem:[#allocation4] sm:$0xff] }
  0x11   :  { %116 = vmatpush.msra.mxu1 %v105_v5  ;;  %70 = vmatpush.msra.mxu0 %v61_v14  ;;  %v53_v32 = vld [vmem:[%s441_s1 + $0x18] sm:$0xff]  ;;  %v52_v34 = vld [vmem:[%s441_s1 + $0x10] sm:$0xff]  ;;  %v51_v35 = vld [vmem:[%s441_s1 + $0x8] sm:$0xff] }
  0x12   :  { %212 = vmatpush.msra.mxu3 %v61_v14  ;;  %166 = vmatpush.msra.mxu2 %v145_v31  ;;  %v50_v36 = vld [vmem:[%s441_s1] sm:$0xff]  ;;  %v94_v40 = vld [vmem:[#allocation3 + $0x8] sm:$0xff] }
  0x13   :  { %117 = vmatpush.msra.mxu1 %v104_v9  ;;  %71 = vmatpush.msra.mxu0 %v60_v16  ;;  %v93_v37 = vld [vmem:[#allocation3] sm:$0xff] }
  0x14   :  { %213 = vmatpush.msra.mxu3 %v60_v16  ;;  %167 = vmatpush.msra.mxu2 %v144_v33  ;;  %v229_v46 = vld [vmem:[%s444_s4] ss:$0 sm:$0xff] }
  0x15   :  { %118 = vmatpush.msra.mxu1 %v103_v11  ;;  %72 = vmatpush.msra.mxu0 %v59_v18 }
  0x16   :  { %214 = vmatpush.msra.mxu3 %v59_v18 }
  0x17   :  { %119 = vmatpush.msra.mxu1 %v102_v13  ;;  %73 = vmatpush.msra.mxu0 %v58_v20 }
  0x18   :  { %215 = vmatpush.msra.mxu3 %v58_v20 }
  0x19   :  { %120 = vmatpush.msra.mxu1 %v101_v15  ;;  %74 = vmatpush.msra.mxu0 %v57_v27 }
  0x1a   :  { %216 = vmatpush.msra.mxu3 %v57_v27 }
  0x1b   :  { %121 = vmatpush.msra.mxu1 %v100_v17  ;;  %75 = vmatpush.msra.mxu0 %v56_v28 }
  0x1c   :  { %217 = vmatpush.msra.mxu3 %v56_v28 }
  0x1d   :  { %122 = vmatpush.msra.mxu1 %v99_v19  ;;  %76 = vmatpush.msra.mxu0 %v55_v29 }
  0x1e   :  { %218 = vmatpush.msra.mxu3 %v55_v29 }
  0x1f   :  { %123 = vmatpush.msra.mxu1 %v98_v21  ;;  %77 = vmatpush.msra.mxu0 %v54_v30 }
  0x20   :  { %219 = vmatpush.msra.mxu3 %v54_v30 }
  0x21   :  { %124 = vmatpush.msra.mxu1 %v97_v22  ;;  %78 = vmatpush.msra.mxu0 %v53_v32 }
  0x22   :  { %220 = vmatpush.msra.mxu3 %v53_v32 }
  0x23   :  { %125 = vmatpush.msra.mxu1 %v96_v23  ;;  %79 = vmatpush.msra.mxu0 %v52_v34 }
  0x24   :  { %221 = vmatpush.msra.mxu3 %v52_v34 }
  0x25   :  { %126 = vmatpush.msra.mxu1 %v95_v24  ;;  %80 = vmatpush.msra.mxu0 %v51_v35 }
  0x26   :  { %127 = vmatmul.f32.vlgmr.msra.gmra.mxu1 %v46_v25  ;;  %222 = vmatpush.msra.mxu3 %v51_v35 }
  0x27   :  { %81 = vmatpush.msra.mxu0 %v50_v36 }
  0x28   :  { %82 = vmatmul.f32.vlgmr.msra.gmra.mxu0 %v46_v25  ;;  %223 = vmatpush.msra.mxu3 %v50_v36 }
  0x29   :  { %85 = vmatmul.f32.vlgmr.msra.gmra.mxu3 %v47_v26 }
  0x2e   :  { %130 = vmatmul.f32.gmra.mxu1 %v47_v26 }
  0xa3   :  { %v128_v38 = vpop.f32.mrf.mxu1 }
  0xa4   :  { %v134_v39 = vadd.f32 %v128_v38, %v93_v37 }
  0xa5   :  { %v83_v45 = vpop.f32.mrf.mxu0 }
  0xa6   :  { %137 = vst.msk [vmem:[#allocation3] sm:$0xff] %vm43_vm0, %v134_v39 }
  0xab   :  { %v131_v41 = vpop.f32.mrf.mxu1 }
  0xac   :  { %v135_v42 = vadd.f32 %v131_v41, %v94_v40  ;;  %v86_v50 = vpop.f32.mrf.mxu3 }
  0xad   :  { %v142_v43 = vld [vmem:[#allocation3] sm:$0xff] }
  0xae   :  { %138 = vst.msk [vmem:[#allocation3 + $0x8] sm:$0xff] %vm43_vm0, %v135_v42  ;;  %206 = vmatmul.msk.f32.vlgmr.msra.gmra.mxu2 %vm43_vm0, %v142_v43 }
  0xb5   :  { %v143_v44 = vld [vmem:[#allocation3 + $0x8] sm:$0xff] }
  0xb6   :  { %207 = vmatmul.msk.f32.gmra.mxu2 %vm43_vm0, %v143_v44 }
 0x131   :  { %v169_v47 = vpop.f32.mrf.mxu2 }
 0x132   :  { %v177_v48 = vadd.f32 %v169_v47, %v83_v45 }
 0x134   :  { %v183_v49 = vadd.f32 %v229_v46, %v177_v48 }
 0x136   :  { %185 = vst [vmem:[#allocation7] sm:$0xff] %v183_v49 }
 0x139   :  { %v172_v51 = vpop.f32.mrf.mxu2 }
 0x13a   :  { %v178_v52 = vadd.f32 %v172_v51, %v86_v50 }
 0x13c   :  { %v184_v53 = vadd.f32 %v229_v46, %v178_v52 }
 0x13e   :  { %186 = vst [vmem:[#allocation7 + $0x8] sm:$0xff] %v184_v53 }
 0x13f   :  { %199 = dma.vmem_to_hbm [thread:$0]  %s192_s19, 256, %s194_s22, [#allocation6], %s283_s23, %s283_s23, %s284_s24  }
 0x140   :  { %280 = dma.done.wait [#allocation6], 256  }
 0x141   :  { %281 = vsyncadd [#allocation6], 4294967040 }
 0x142   :  { %204 = vsyncpa [#allocation5], 1 }
 0x143   :  { %205 = vsyncpa [#allocation6], 1 }

</bundles_post_ra>
